<compile_context>
chip_gen: v7x
topology: tpu7x:2x2x1
jax: 0.10.0
libtpu: 0.0.40
codegen_flags: <defaults>
</compile_context>

<pallas_src>
import re

import jax
import jax.numpy as jnp
from jax.experimental import pallas as pl
from jax.experimental.pallas import tpu as pltpu


_ACTIVATIONS = {
    "tanh": jnp.tanh,
    "relu": lambda v: jnp.maximum(v, jnp.zeros_like(v)),
    "sigmoid": jax.nn.sigmoid,
}


def _round_up(x, m):
    return ((x + m - 1) // m) * m


def _cdiv(a, b):
    return -(-a // b)


def _tpu_generation_and_vmem():
    """Best-effort chip generation + physical VMEM bytes (per TensorCore)."""
    gen = 0
    try:
        kind = jax.devices()[0].device_kind  # e.g. "TPU v5 lite", "TPU v6e"
        m = re.search(r"(\d+)", kind)
        if m:
            gen = int(m.group(1))
    except Exception:
        gen = 0
    vmem = None
    try:
        vmem = int(pltpu.get_tpu_info().vmem_capacity_bytes)
        if vmem <= 0:
            vmem = None
    except Exception:
        vmem = None
    if vmem is None:
        # v5e/v6e (and v4) have 128 MiB VMEM; v7x has 64 MiB; unknown -> conservative.
        vmem = (128 << 20) if gen in (4, 5, 6) else (64 << 20)
    return gen, vmem


# ---------------------------------------------------------------------------
# Probe: does this JAX honor pipeline_mode=pl.Buffered(1) on a BlockSpec?
# ---------------------------------------------------------------------------
_SINGLE_BUFFER_WEIGHTS = None


def _probe_kernel(w_ref, o_ref):
    o_ref[...] = w_ref[...] * 2.0


def _single_buffer_supported():
    global _SINGLE_BUFFER_WEIGHTS
    if _SINGLE_BUFFER_WEIGHTS is None:
        try:
            w_spec = pl.BlockSpec((8, 128), lambda i: (0, 0),
                                  pipeline_mode=pl.Buffered(1))
            y = pl.pallas_call(
                _probe_kernel,
                out_shape=jax.ShapeDtypeStruct((16, 128), jnp.float32),
                grid=(2,),
                in_specs=[w_spec],
                out_specs=pl.BlockSpec((8, 128), lambda i: (i, 0)),
            )(jnp.ones((8, 128), jnp.float32))
            _SINGLE_BUFFER_WEIGHTS = bool(jnp.all(y == 2.0))
        except Exception:
            _SINGLE_BUFFER_WEIGHTS = False
    return _SINGLE_BUFFER_WEIGHTS


# ---------------------------------------------------------------------------
# Kernel
# ---------------------------------------------------------------------------
def _make_mlp_kernel(n_layers, activation, act_on_last, compute_dtype, precision):
    """Kernel ref order: (x, W1, b1, ..., Wn, bn, out)."""
    act = _ACTIVATIONS[activation]

    def kernel(*refs):
        x_ref, o_ref = refs[0], refs[-1]
        x = x_ref[...]
        for i in range(n_layers):
            w = refs[1 + 2 * i][...]
            b = refs[2 + 2 * i][...]            # (1, out_pad) -> broadcasts
            lhs = x if x.dtype == w.dtype else x.astype(w.dtype)
            # MXU matmul in the weights' native dtype, accumulate in f32.
            y = jnp.dot(lhs, w, preferred_element_type=jnp.float32,
                        precision=precision)
            # Bias add + activation in compute_dtype (bf16 on v6e/v7x, f32 on v5e).
            y = y.astype(compute_dtype) + b.astype(compute_dtype)
            if i != n_layers - 1 or act_on_last:
                y = act(y)
            x = y
        o_ref[...] = x.astype(o_ref.dtype)

    return kernel


# ---------------------------------------------------------------------------
# Factory: pads/casts weights once, returns forward(state)
# ---------------------------------------------------------------------------
def make_feedforward_nn(params, activation="tanh", *, batch_tile=None,
                        lane_pad=None, precision=None):
    """Pre-pads / pre-casts `params` once and returns `forward(state)`.

    params : list of (W, b) with W: (in_features, out_features), b: (out_features,)
             (i.e. each layer computes x @ W + b). f32 or bf16.
    Output dtype matches the weight dtype.
    """
    if activation not in _ACTIVATIONS:
        raise ValueError(f"unknown activation: {activation}")
    n_layers = len(params)
    if n_layers == 0:
        raise ValueError("params must contain at least one layer")

    gen, vmem_phys = _tpu_generation_and_vmem()
    budget = int(0.6 * vmem_phys)          # scoped-VMEM budget we will request

    weight_dtype = jnp.dtype(params[0][0].dtype)
    is_bf16 = (weight_dtype == jnp.dtype(jnp.bfloat16))
    stream_dtype = weight_dtype            # activations stream in weight dtype
    stream_itemsize = stream_dtype.itemsize
    sub = max(8, 32 // stream_itemsize)    # sublane multiple: 8 f32, 16 bf16

    # bf16 VPU/EUP only on v6e/v7x -> bias/activation math dtype.
    compute_dtype = jnp.bfloat16 if (is_bf16 and gen >= 6) else jnp.float32
    # f32 MXU matmul gets explicit full precision; bf16 uses the native path.
    if precision is None and not is_bf16:
        precision = jax.lax.Precision.HIGHEST

    in_size = params[0][0].shape[0]
    out_size = params[-1][0].shape[1]

    # ---- lane-dense feature padding (256-wide MXU tiles on v6e/v7x bf16) ----
    feat_sizes = [in_size] + [w.shape[1] for (w, _) in params]
    if lane_pad is not None:
        feat_pad = [_round_up(s, lane_pad) for s in feat_sizes]
    else:
        big = 256 if (is_bf16 and gen >= 6) else 128
        feat_pad = [_round_up(s, 128) if s <= 128 else _round_up(s, big)
                    for s in feat_sizes]

    # ---- pad / cast weights ONCE (cached in this closure) ----
    padded_params = []
    for i, (w, b) in enumerate(params):
        fi, fo = w.shape
        wp = jnp.zeros((feat_pad[i], feat_pad[i + 1]), weight_dtype)
        wp = wp.at[:fi, :fo].set(w.astype(weight_dtype))
        bp = jnp.zeros((1, feat_pad[i + 1]), weight_dtype)
        bp = bp.at[0, :fo].set(b.astype(weight_dtype))
        padded_params.append((wp, bp))

    single_buffer = _single_buffer_supported()
    wt_mult = 1 if single_buffer else 2

    def _const_spec(shape):
        if single_buffer:
            return pl.BlockSpec(shape, lambda i: (0, 0),
                                pipeline_mode=pl.Buffered(1))
        return pl.BlockSpec(shape, lambda i: (0, 0))

    def _est(layer_ids, tile):
        """Resident VMEM bytes for one layer group at batch tile `tile`."""
        in_f = feat_pad[layer_ids[0]]
        out_f = feat_pad[layer_ids[-1] + 1]
        max_f = max(feat_pad[layer_ids[0]: layer_ids[-1] + 2])
        w_bytes = sum(int(w.size) * w.dtype.itemsize + int(b.size) * b.dtype.itemsize
                      for (w, b) in (padded_params[l] for l in layer_ids))
        stream = tile * (in_f + out_f) * stream_itemsize   # in + out tiles
        acts = tile * max_f * 4                            # f32 intermediates
        return wt_mult * w_bytes + 2 * stream + 4 * acts + (2 << 20)

    def _make_groups(tile):
        groups, cur = [], []
        for l in range(n_layers):
            if cur and _est(cur + [l], tile) > budget:
                groups.append(cur)
                cur = [l]
            else:
                cur = cur + [l]
        groups.append(cur)
        return groups

    def _run_group(x_p, layer_ids, bt, b_pad):
        n_g = len(layer_ids)
        act_on_last = (layer_ids[-1] != n_layers - 1)
        kernel = _make_mlp_kernel(n_g, activation, act_on_last,
                                  compute_dtype, precision)
        in_f = feat_pad[layer_ids[0]]
        out_f = feat_pad[layer_ids[-1] + 1]

        flat = [x_p]
        in_specs = [pl.BlockSpec((bt, in_f), lambda i: (i, 0))]
        for l in layer_ids:
            wp, bp = padded_params[l]
            flat += [wp, bp]
            in_specs.append(_const_spec(wp.shape))
            in_specs.append(_const_spec(bp.shape))

        vmem_limit = int(min(max(_est(layer_ids, bt), 8 << 20), budget))
        return pl.pallas_call(
            kernel,
            out_shape=jax.ShapeDtypeStruct((b_pad, out_f), stream_dtype),
            grid=(b_pad // bt,),
            in_specs=in_specs,
            out_specs=pl.BlockSpec((bt, out_f), lambda i: (i, 0)),
            compiler_params=pltpu.CompilerParams(
                dimension_semantics=("parallel",),
                vmem_limit_bytes=vmem_limit,
            ),
        )(*flat)

    def forward(state):
        squeeze = (state.ndim == 1)
        if squeeze:
            state = state[None, :]
        batch = state.shape[0]
        if state.shape[1] != in_size:
            raise ValueError(
                f"expected state feature dim {in_size}, got {state.shape[1]}")

        # ---- batch tile: big tiles amortize the ~0.35us/step overhead ----
        if batch_tile is None:
            target = 256 if gen >= 7 else 512
            bt = min(_round_up(batch, sub), target)
        else:
            bt = batch_tile
        bt = max(sub, _round_up(bt, sub))
        # v7x: 2 TensorCores/chip -> keep >=2 grid steps so "parallel" shards.
        if gen >= 7 and batch >= 2 * sub:
            half = _round_up(_cdiv(_round_up(batch, sub), sub * 2) * sub, sub)
            half = max(sub, _round_up(_cdiv(_round_up(batch, sub), 2), sub))
            bt = min(bt, half)

        # ---- group layers so each group's resident set fits the VMEM budget ----
        while True:
            groups = _make_groups(bt)
            if bt <= sub or all(_est(g, bt) <= budget for g in groups):
                break
            bt = max(sub, _round_up(bt // 2, sub))
        # TODO(synk): if a single layer's padded weights alone exceed the VMEM
        # budget even at the minimum batch tile, K-tile that layer (trailing
        # "arbitrary" grid axis, f32 accumulator scratch, pl.when(k==0) init)
        # instead of whole-layer residency.

        b_pad = _round_up(batch, bt)

        # Lane-dense, stream-dtype state slab (bf16 halves streamed DMA bytes).
        x_p = jnp.zeros((b_pad, feat_pad[0]), stream_dtype)
        x_p = x_p.at[:batch, :in_size].set(state.astype(stream_dtype))

        for g in groups:
            x_p = _run_group(x_p, g, bt, b_pad)

        out = x_p[:batch, :out_size]
        return out[0] if squeeze else out

    return forward


def feedforward_nn_forward(state, params, activation="tanh", **kwargs):
    """One-shot convenience wrapper. Prefer make_feedforward_nn(...) and reuse
    the returned forward() so weight padding/casting is done only once."""
    return make_feedforward_nn(params, activation=activation, **kwargs)(state)


# ---------------------------------------------------------------------------
# Parameter init (PyTorch nn.Linear-style uniform bounds) and pure-JAX reference
# ---------------------------------------------------------------------------
def init_params(key, input_size, hidden_size, output_size, n_layers=2,
                dtype=jnp.float32):
    params = []
    for i in range(n_layers):
        if i == 0:
            fan_in, fan_out = input_size, hidden_size
        elif i < n_layers - 1:
            fan_in, fan_out = hidden_size, hidden_size
        else:
            fan_in, fan_out = hidden_size, output_size
        key, kw, kb = jax.random.split(key, 3)
        bound = 1.0 / jnp.sqrt(fan_in)
        # Stored as (in, out) so the kernel computes x @ W + b.
        w = jax.random.uniform(kw, (fan_in, fan_out), jnp.float32, -bound, bound)
        b = jax.random.uniform(kb, (fan_out,), jnp.float32, -bound, bound)
        params.append((w.astype(dtype), b.astype(dtype)))
    return params


def _reference_forward(state, params, activation="tanh"):
    act = _ACTIVATIONS[activation]
    x = state.astype(jnp.float32)
    n = len(params)
    for i, (w, b) in enumerate(params):
        x = x @ w.astype(jnp.float32) + b.astype(jnp.float32)
        if i != n - 1:
            x = act(x)
    return x


if __name__ == "__main__":
    key = jax.random.PRNGKey(0)

    # ---- test 1: f32 weights, tanh, tiny shapes (module-consistent) ----
    batch, input_size, hidden_size, output_size, n_layers = 8, 4, 32, 2, 2
    key, kx = jax.random.split(key)
    state = jax.random.normal(kx, (batch, input_size), jnp.float32)
    params = init_params(key, input_size, hidden_size, output_size, n_layers)
    fwd = make_feedforward_nn(params, activation="tanh")
    out = jax.block_until_ready(fwd(state))
    ref = _reference_forward(state, params, "tanh")
    assert out.shape == (batch, output_size)
    assert jnp.allclose(out, ref, atol=1e-5, rtol=1e-5), "f32 mismatch vs reference"

    # ---- test 2: bf16 weights (bf16 streaming + f32 MXU accumulation) ----
    params_bf16 = [(w.astype(jnp.bfloat16), b.astype(jnp.bfloat16))
                   for (w, b) in params]
    fwd_bf16 = make_feedforward_nn(params_bf16, activation="tanh")
    out_bf16 = jax.block_until_ready(fwd_bf16(state))
    assert out_bf16.shape == (batch, output_size)
    assert jnp.allclose(out_bf16.astype(jnp.float32), ref, atol=5e-2, rtol=5e-2), \
        "bf16 mismatch vs reference"

    # ---- test 3: sigmoid + non-multiple-of-128 dims (padding regression) ----
    key, kx3 = jax.random.split(key)
    state3 = jax.random.normal(kx3, (5, 7), jnp.float32)
    key, kp3 = jax.random.split(key)
    params3 = init_params(kp3, 7, 48, 3, n_layers=3)
    fwd3 = make_feedforward_nn(params3, activation="sigmoid")
    out3 = jax.block_until_ready(fwd3(state3))
    ref3 = _reference_forward(state3, params3, "sigmoid")
    assert out3.shape == (5, 3)
    assert jnp.allclose(out3, ref3, atol=1e-5, rtol=1e-5), "sigmoid padding mismatch"

    # ---- test 4: multi-step batch grid + bf16 + hidden>128 (wide-pad path) ----
    key, kx4 = jax.random.split(key)
    state4 = jax.random.normal(kx4, (300, 24), jnp.float32)
    key, kp4 = jax.random.split(key)
    params4 = init_params(kp4, 24, 160, 6, n_layers=3, dtype=jnp.bfloat16)
    fwd4 = make_feedforward_nn(params4, activation="relu", batch_tile=128)
    out4 = jax.block_until_ready(fwd4(state4))
    ref4 = _reference_forward(state4, params4, "relu")
    assert out4.shape == (300, 6)
    max_err = float(jnp.max(jnp.abs(out4.astype(jnp.float32) - ref4)))
    assert max_err < 0.2, f"bf16 wide-layer mismatch: max_err={max_err}"

    print("KERNEL_OK")
</pallas_src>

<mosaic_0001>
module attributes {stable_mosaic.version = 11 : i64} {
  func.func @_probe_kernel(%arg0: i32, %arg1: memref<8x128xf32, #tpu.memory_space<vmem>>, %arg2: memref<8x128xf32, #tpu.memory_space<vmem>>) attributes {dimension_semantics = [#tpu.dimension_semantics<arbitrary>], iteration_bounds = array<i64: 2>, scalar_prefetch = 0 : i64, scratch_operands = 0 : i64, tpu.core_type = #tpu.core_type<tc>, window_params = [{pipeline_mode = #tpu.pipeline_mode<synchronous>, transform_indices = @transform_0, window_bounds = array<i64: 8, 128>}, {transform_indices = @transform_1, window_bounds = array<i64: 8, 128>}]} {
    %c0 = arith.constant 0 : index
    %c0_0 = arith.constant 0 : index
    %0 = vector.load %arg1[%c0, %c0_0] : memref<8x128xf32, #tpu.memory_space<vmem>>, vector<8x128xf32>
    %cst = arith.constant 2.000000e+00 : f32
    %1 = vector.broadcast %cst : f32 to vector<8x128xf32>
    %2 = arith.mulf %0, %1 : vector<8x128xf32>
    %c0_1 = arith.constant 0 : index
    %c0_2 = arith.constant 0 : index
    %3 = vector.load %arg2[%c0_1, %c0_2] : memref<8x128xf32, #tpu.memory_space<vmem>>, vector<8x128xf32>
    tpu.vector_store %arg2[%c0_1, %c0_2], %2 {strides = array<i32>} : memref<8x128xf32, #tpu.memory_space<vmem>>, vector<8x128xf32>,
    return
  }
  func.func @transform_0(%arg0: i32) -> (i32, i32) {
    %c0_i32 = arith.constant 0 : i32
    %c0_i32_0 = arith.constant 0 : i32
    %c0_i32_1 = arith.constant 0 : i32
    return %c0_i32, %c0_i32_0 : i32, i32
  }
  func.func @transform_1(%arg0: i32) -> (i32, i32) {
    %c0_i32 = arith.constant 0 : i32
    %c0_i32_0 = arith.constant 0 : i32
    return %arg0, %c0_i32 : i32, i32
  }
}

module attributes {stable_mosaic.version = 11 : i64} {
  func.func @kernel(%arg0: i32, %arg1: memref<8x128xf32, #tpu.memory_space<vmem>>, %arg2: memref<128x128xf32, #tpu.memory_space<vmem>>, %arg3: memref<1x128xf32, #tpu.memory_space<vmem>>, %arg4: memref<128x128xf32, #tpu.memory_space<vmem>>, %arg5: memref<1x128xf32, #tpu.memory_space<vmem>>, %arg6: memref<8x128xf32, #tpu.memory_space<vmem>>) attributes {dimension_semantics = [#tpu.dimension_semantics<parallel>], iteration_bounds = array<i64: 1>, scalar_prefetch = 0 : i64, scratch_operands = 0 : i64, tpu.core_type = #tpu.core_type<tc>, window_params = [{transform_indices = @transform_0, window_bounds = array<i64: 8, 128>}, {pipeline_mode = #tpu.pipeline_mode<synchronous>, transform_indices = @transform_1, window_bounds = array<i64: 128, 128>}, {pipeline_mode = #tpu.pipeline_mode<synchronous>, transform_indices = @transform_2, window_bounds = array<i64: 1, 128>}, {pipeline_mode = #tpu.pipeline_mode<synchronous>, transform_indices = @transform_3, window_bounds = array<i64: 128, 128>}, {pipeline_mode = #tpu.pipeline_mode<synchronous>, transform_indices = @transform_4, window_bounds = array<i64: 1, 128>}, {transform_indices = @transform_5, window_bounds = array<i64: 8, 128>}]} {
    %c0 = arith.constant 0 : index
    %c0_0 = arith.constant 0 : index
    %0 = vector.load %arg1[%c0, %c0_0] : memref<8x128xf32, #tpu.memory_space<vmem>>, vector<8x128xf32>
    %c0_1 = arith.constant 0 : index
    %c0_2 = arith.constant 0 : index
    %1 = vector.load %arg2[%c0_1, %c0_2] : memref<128x128xf32, #tpu.memory_space<vmem>>, vector<128x128xf32>
    %c0_3 = arith.constant 0 : index
    %c0_4 = arith.constant 0 : index
    %2 = vector.load %arg3[%c0_3, %c0_4] : memref<1x128xf32, #tpu.memory_space<vmem>>, vector<1x128xf32>
    %cst = arith.constant dense<0.000000e+00> : vector<8x128xf32>
    %3 = tpu.matmul %0, %1, %cst {dimension_numbers = #tpu.dot_dimension_numbers<[1], [0], [0], [1], [0, 0, 1, 1], [], []>, precision = #tpu.contract_precision<fp32>} : vector<8x128xf32>, vector<128x128xf32>, vector<8x128xf32> -> vector<8x128xf32>
    %4 = vector.broadcast %2 : vector<1x128xf32> to vector<8x128xf32>
    %5 = arith.addf %3, %4 : vector<8x128xf32>
    %6 = math.tanh %5 : vector<8x128xf32>
    %c0_5 = arith.constant 0 : index
    %c0_6 = arith.constant 0 : index
    %7 = vector.load %arg4[%c0_5, %c0_6] : memref<128x128xf32, #tpu.memory_space<vmem>>, vector<128x128xf32>
    %c0_7 = arith.constant 0 : index
    %c0_8 = arith.constant 0 : index
    %8 = vector.load %arg5[%c0_7, %c0_8] : memref<1x128xf32, #tpu.memory_space<vmem>>, vector<1x128xf32>
    %cst_9 = arith.constant dense<0.000000e+00> : vector<8x128xf32>
    %9 = tpu.matmul %6, %7, %cst_9 {dimension_numbers = #tpu.dot_dimension_numbers<[1], [0], [0], [1], [0, 0, 1, 1], [], []>, precision = #tpu.contract_precision<fp32>} : vector<8x128xf32>, vector<128x128xf32>, vector<8x128xf32> -> vector<8x128xf32>
    %10 = vector.broadcast %8 : vector<1x128xf32> to vector<8x128xf32>
    %11 = arith.addf %9, %10 : vector<8x128xf32>
    %c0_10 = arith.constant 0 : index
    %c0_11 = arith.constant 0 : index
    %12 = vector.load %arg6[%c0_10, %c0_11] : memref<8x128xf32, #tpu.memory_space<vmem>>, vector<8x128xf32>
    tpu.vector_store %arg6[%c0_10, %c0_11], %11 {strides = array<i32>} : memref<8x128xf32, #tpu.memory_space<vmem>>, vector<8x128xf32>,
    return
  }
  func.func @transform_0(%arg0: i32) -> (i32, i32) {
    %c0_i32 = arith.constant 0 : i32
    %c0_i32_0 = arith.constant 0 : i32
    return %arg0, %c0_i32 : i32, i32
  }
  func.func @transform_1(%arg0: i32) -> (i32, i32) {
    %c0_i32 = arith.constant 0 : i32
    %c0_i32_0 = arith.constant 0 : i32
    %c0_i32_1 = arith.constant 0 : i32
    return %c0_i32, %c0_i32_0 : i32, i32
  }
  func.func @transform_2(%arg0: i32) -> (i32, i32) {
    %c0_i32 = arith.constant 0 : i32
    %c0_i32_0 = arith.constant 0 : i32
    %c0_i32_1 = arith.constant 0 : i32
    return %c0_i32, %c0_i32_0 : i32, i32
  }
  func.func @transform_3(%arg0: i32) -> (i32, i32) {
    %c0_i32 = arith.constant 0 : i32
    %c0_i32_0 = arith.constant 0 : i32
    %c0_i32_1 = arith.constant 0 : i32
    return %c0_i32, %c0_i32_0 : i32, i32
  }
  func.func @transform_4(%arg0: i32) -> (i32, i32) {
    %c0_i32 = arith.constant 0 : i32
    %c0_i32_0 = arith.constant 0 : i32
    %c0_i32_1 = arith.constant 0 : i32
    return %c0_i32, %c0_i32_0 : i32, i32
  }
  func.func @transform_5(%arg0: i32) -> (i32, i32) {
    %c0_i32 = arith.constant 0 : i32
    %c0_i32_0 = arith.constant 0 : i32
    return %arg0, %c0_i32 : i32, i32
  }
}

</mosaic_0001>

<bundles_post_ra>
// kernel: tpu_custom_call.1
= control target key start
LH: loop header
LB: loop body
LE: loop exit
PB: predicated region body
PF: predicated region fallthrough
CT: control target
= control target key end

     0   :  { %6 = vsyncpa [#allocation3], 0  ;;  %s482_s0 = inlined_call_operand.hbm [shape: f32[8,128], index: 0, kind: input, shape index: {}]   ;;  %s483_s1 = inlined_call_operand.hbm [shape: f32[16,128], index: 1, kind: output, shape index: {}]  }
   0x1   :  { %7 = vsyncpa [#allocation4], 0 }
   0x2   :  { %9 = vsyncpa [#allocation4 + $0x1], 0  ;;  %s352_s6 = smov 0   ;;  %s354_s7 = smov 0  }
   0x3   :  { %s356_s8 = smov 0   ;;  %s358_s9 = smov 0  }
   0x4 LB: > { %s373_s10 = sadd.s32 4294967295, %s338_s9   ;;  %s184_s11 = sadd.s32 4294967294, %s338_s9   ;;  %s338_s9 = sphi %s358_s9, %s499_s9   ;;  %s334_s8 = sphi %s356_s8, %s498_s8   ;;  %s330_s7 = sphi %s354_s7, %s497_s7   ;;  %s326_s6 = sphi %s352_s6, %s496_s6  }
   0x5   : > { %s377_s12 = sadd.s32 1, %s338_s9   ;;  %s43_s13 = sadd.s32 1, %s334_s8 }
   0x6   : > { %s40_s14 = ssub.s32 %s338_s9, %s377_s12  ;;  %p53_p0 = scmp.ne.s32.totalorder %s334_s8, %s330_s7 }
   0x7   : > { %p41_p1 = scmp.eq.s32.totalorder %s40_s14, 0  ;;  %p54_p2 = scmp.eq.s32.totalorder %s373_s10, 1 }
   0x8   : > { %p59_p3 = scmp.ne.s32.totalorder %s330_s7, %s326_s6  ;;  %p60_p4 = scmp.eq.s32.totalorder %s184_s11, 1 }
   0x9   : > { %s388_s15 = scalar_select %p41_p1, %s334_s8, %s43_s13  }
   0xa   : > { %p390_p5 = por %p54_p2, %p53_p0  ;;  %p394_p6 = por %p60_p4, %p59_p3 }
   0xb   : > { %p185_p7 = scmp.ge.s32.totalorder %s338_s9, 1  ;;  %p67_p8 = scmp.lt.s32.totalorder %s338_s9, 3 }
   0xc   : > { %s487_s16 = scalar_select %p390_p5, 1, 0 }
   0xd   : > { %s488_s17 = scalar_select %p394_p6, 1, 0 }
   0xe   : > { %p484_p9 = scmp.eq.s32.totalorder %s373_s10, 0  ;;  %p401_p10 = pnand %p185_p7, %p67_p8 }
   0xf   : > { %s340_s19 = smov [#allocation2]   ;;  %s244_s24 = scalar_lea.hbm %s482_s0, 128 }
  0x10   : > { %s489_s18 = scalar_select %p401_p10, 1, 0 }
  0x11   : > { %s80_s20 = sshll.u32 %s340_s19, 4  ;;  %p200_p11 = pneg %p401_p10  ;;  %s81_s20 = int_to_ptr.vmem [resolvable:$true] %s80_s20 }
  0x12   : > { %p245_p13 = scmp.ne.s32.totalorder %s482_s0, %s244_s24  ;;  %p251_p3 = scmp.lt.u32.totalorder %s244_s24, %s482_s0 }
  0x13   : > { %p409_p12 = pnand %p484_p9, %p200_p11 }
  0x15   : > { %p246_p0 = pneg %p409_p12 }
  0x17   : > { %p247_p1 = pnand %p246_p0, %p245_p13 }
  0x19   : > { %p248_p2 = pneg %p247_p1 }
  0x1b   : > { %p253_p4 = pnand %p251_p3, %p248_p2 }
  0x1d   : > { %256 = shalt.err (!%p253_p4)
}
  0x1e   : > { %s257_s29 = scalar_lea.vmem %s81_s20, 128  ;;  %p265_p9 = scmp.lt.s32.totalorder %s81_s20, %s81_s20 }
  0x1f   : > { %p258_p7 = scmp.ne.s32.totalorder %s81_s20, %s257_s29  ;;  %p266_p6 = scmp.lt.s32.totalorder %s257_s29, %s257_s29 }
  0x21   : > { %p260_p8 = pnand %p258_p7, %p246_p0  ;;  %p267_p5 = por %p266_p6, %p265_p9 }
  0x23   : > { %p261_p11 = pneg %p260_p8 }
  0x25   : > { %p268_p10 = pnand %p267_p5, %p261_p11 }
  0x27   : > { %271 = shalt.err (!%p268_p10)
}
  0x28   : > { %203 = dma.hbm_to_vmem [thread:$0]  (!%p409_p12), %s482_s0, 128, %s81_s20, [#allocation3]  }
  0x29   : > { %p491_p13 = scmp.ne.s32.totalorder %s489_s18, 0 }
  0x2a   : > { %p492_p1 = scmp.eq.s32.totalorder (!%p491_p13), %s373_s10, 0 }
  0x2b   : > { %93 = sbr.rel (%p491_p13) target bundleno = 77 (0x4d), region = 24 }
  0x32   : > { %317 = dma.done.wait (%p492_p1), [#allocation3], 128   ;;  %p493_p0 = pmov %p492_p1 }
  0x33   : > { %s105_s3 = sand.u32 1, %s330_s7   ;;  %s191_s13 = sshll.u32 %s373_s10, 7  ;;  %v108_v0 = vld [vmem:[#allocation2] sm:$0xff] }
  0x34   : > { %319 = vsyncadd (%p493_p0), [#allocation3], 4294967168  ;;  %s189_s4 = sshll.u32 %s105_s3, 3  ;;  %v109_v1 = vmul.f32 2.0, %v108_v0  ;;  %s442_s19 = scalar_lea.hbm %s483_s1, %s191_s13 }
  0x35   : > { %s107_s5 = scalar_lea.vmem [#allocation5], %s189_s4  ;;  %s112_s20 = scalar_lea.sflag [#allocation4], %s105_s3 }
  0x36   : > { %s125_s11 = sshll.u32 %s107_s5, 4  ;;  %110 = vst [vmem:[%s107_s5] sm:$0xff] %v109_v1  ;;  %p494_p6 = scmp.ne.s32.totalorder %s487_s16, 0  ;;  %s437_s11 = int_to_ptr.vmem [resolvable:$true] %s125_s11 }
  0x37   : > { %s272_s21 = scalar_lea.vmem %s437_s11, 128  ;;  %s341_s10 = smov [#allocation5]  }
  0x38   : > { %p273_p5 = scmp.ne.s32.totalorder %s437_s11, %s272_s21  ;;  %s276_s22 = sshll.u32 %s341_s10, 4  ;;  %s277_s22 = int_to_ptr.vmem [resolvable:$false] %s276_s22 }
  0x39   : > { %s278_s23 = scalar_lea.vmem %s277_s22, 256  ;;  %p279_p12 = scmp.lt.s32.totalorder %s437_s11, %s277_s22 }
  0x3a   : > { %p274_p9 = pnand %p273_p5, %p494_p6  ;;  %p280_p2 = scmp.lt.s32.totalorder %s278_s23, %s272_s21 }
  0x3c   : > { %p275_p10 = pneg %p274_p9  ;;  %p281_p3 = por %p280_p2, %p279_p12 }
  0x3e   : > { %p282_p4 = pnand %p281_p3, %p275_p10 }
  0x40   : > { %285 = shalt.err (!%p282_p4)
}
  0x41   : > { %s286_s24 = scalar_lea.hbm %s442_s19, 128  ;;  %s290_s27 = scalar_lea.hbm %s483_s1, 256 }
  0x42   : > { %p287_p7 = scmp.ne.s32.totalorder %s442_s19, %s286_s24  ;;  %p291_p13 = scmp.lt.u32.totalorder %s442_s19, %s483_s1 }
  0x43   : > { %p292_p1 = scmp.lt.u32.totalorder %s290_s27, %s286_s24  ;;  %p294_p5 = scmp.lt.u32.totalorder %s286_s24, %s442_s19 }
  0x44   : > { %p288_p8 = pnand %p287_p7, %p494_p6 }
  0x45   : > { %p293_p0 = por %p292_p1, %p291_p13 }
  0x46   : > { %p289_p11 = pneg %p288_p8 }
  0x47   : > { %p295_p9 = por %p294_p5, %p293_p0 }
  0x49   : > { %p296_p10 = pnand %p295_p9, %p289_p11 }
  0x4b   : > { %299 = shalt.err (!%p296_p10)
}
  0x4c   : > { %198 = dma.vmem_to_hbm [thread:$0]  (%p494_p6), %s437_s11, 128, %s442_s19, %s112_s20  }
  0x4d PF: > { %p210_p12 = scmp.ge.s32.totalorder %s338_s9, 2  ;;  %s137_s30 = sand.u32 1, %s326_s6  }
  0x4e   : > { %p495_p2 = scmp.ne.s32.totalorder %s488_s17, 0  ;;  %s138_s2 = scalar_lea.sflag [#allocation4], %s137_s30 }
  0x50   : > { %p205_p3 = pnand %p210_p12, %p495_p2 }
  0x52   : > { %321 = dma.done.wait (!%p205_p3), %s138_s2, 128  }
  0x53   : > { %323 = vsyncadd (!%p205_p3), %s138_s2, 4294967168  ;;  %p12_p4 = scmp.ge.s32.totalorder %s377_s12, 4   ;;  %s496_s6 = smov %s330_s7 }
  0x54   : > { %s497_s7 = smov %s334_s8  ;;  %s498_s8 = smov %s388_s15 }
  0x55   : > { %s499_s9 = smov %s377_s12  ;;  %14 = sbr.rel (!%p12_p4) target bundleno = 4 (0x4), region = 61 }
  0x5c   :  { %143 = vsyncpa [#allocation3], 1 }
  0x5d   :  { %145 = vsyncpa [#allocation3 + $0x1], 1 }
  0x5e   :  { %146 = vsyncpa [#allocation4], 1 }
  0x5f   :  { %148 = vsyncpa [#allocation4 + $0x1], 1 }

// kernel: tpu_custom_call.1
= control target key start
LH: loop header
LB: loop body
LE: loop exit
PB: predicated region body
PF: predicated region fallthrough
CT: control target
= control target key end

     0   :  { %10 = vsyncpa [#allocation3], 0  ;;  %s3022_s0 = inlined_call_operand.hbm [shape: f32[8,128], index: 0, kind: input, shape index: {}]   ;;  %s3023_s1 = inlined_call_operand.hbm [shape: f32[128,128], index: 1, kind: input, shape index: {}]   ;;  %s3024_s2 = inlined_call_operand.vmem [shape: f32[1,128], index: 2, kind: input, shape index: {}]   ;;  %s3025_s3 = inlined_call_operand.hbm [shape: f32[128,128], index: 3, kind: input, shape index: {}]   ;;  %s3026_s4 = inlined_call_operand.vmem [shape: f32[1,128], index: 4, kind: input, shape index: {}]   ;;  %s3027_s5 = inlined_call_operand.hbm [shape: f32[8,128], index: 5, kind: output, shape index: {}]  }
   0x1   :  { %11 = vsyncpa [#allocation6], 0 }
   0x2   :  { %12 = vsyncpa [#allocation4], 0  ;;  %s2448_s18 = smov [#allocation5]   ;;  %s2354_s22 = scalar_lea.hbm %s3023_s1, 2048 }
   0x3   :  { %s28_s19 = sshll.u32 %s2448_s18, 4  ;;  %p2355_p0 = scmp.ne.s32.totalorder %s3023_s1, %s2354_s22  ;;  %s29_s19 = int_to_ptr.vmem [resolvable:$true] %s28_s19 }
   0x4   :  { %p2358_p1 = scmp.lt.u32.totalorder %s2354_s22, %s3023_s1 }
   0x6   :  { %p2360_p2 = pnand %p2358_p1, %p2355_p0 }
   0x8   :  { %2363 = shalt.err (!%p2360_p2)
}
   0x9   :  { %s2364_s27 = scalar_lea.vmem %s29_s19, 2048  ;;  %p2369_p4 = scmp.lt.s32.totalorder %s29_s19, %s29_s19 }
   0xa   :  { %p2365_p3 = scmp.ne.s32.totalorder %s29_s19, %s2364_s27  ;;  %p2370_p5 = scmp.lt.s32.totalorder %s2364_s27, %s2364_s27 }
   0xc   :  { %p2371_p6 = por %p2370_p5, %p2369_p4 }
   0xe   :  { %p2372_p7 = pnand %p2371_p6, %p2365_p3 }
  0x10   :  { %2375 = shalt.err (!%p2372_p7)
}
  0x11   :  { %s2449_s28 = smov 128   ;;  %s2450_s29 = smov 8  }
  0x12   :  { %34 = dma.hbm_to_vmem [thread:$0]  %s3023_s1, 2048, %s29_s19, [#allocation6], %s2449_s28, %s2449_s28, %s2450_s29  }
  0x13   :  { %s2451_s7 = smov [#allocation2]   ;;  %s2452_s9 = smov [#allocation7]  }
  0x14   :  { %s19_s8 = sshll.u32 %s2451_s7, 4  ;;  %s42_s10 = sshll.u32 %s2452_s9, 4  ;;  %s20_s8 = int_to_ptr.vmem [resolvable:$true] %s19_s8  ;;  %s43_s10 = int_to_ptr.vmem [resolvable:$true] %s42_s10 }
  0x15   :  { %s2376_s13 = scalar_lea.hbm %s3022_s0, 128 }
  0x16   :  { %p2377_p8 = scmp.ne.s32.totalorder %s3022_s0, %s2376_s13  ;;  %p2380_p9 = scmp.lt.u32.totalorder %s2376_s13, %s3022_s0 }
  0x18   :  { %p2382_p10 = pnand %p2380_p9, %p2377_p8 }
  0x1a   :  { %2385 = shalt.err (!%p2382_p10)
}
  0x1b   :  { %s2386_s1 = scalar_lea.vmem %s20_s8, 128  ;;  %p2391_p12 = scmp.lt.s32.totalorder %s20_s8, %s20_s8 }
  0x1c   :  { %p2387_p11 = scmp.ne.s32.totalorder %s20_s8, %s2386_s1  ;;  %p2392_p13 = scmp.lt.s32.totalorder %s2386_s1, %s2386_s1 }
  0x1e   :  { %p2393_p0 = por %p2392_p13, %p2391_p12 }
  0x20   :  { %p2394_p1 = pnand %p2393_p0, %p2387_p11 }
  0x22   :  { %2397 = shalt.err (!%p2394_p1)
}
  0x23   :  { %22 = dma.hbm_to_vmem [thread:$0]  %s3022_s0, 128, %s20_s8, [#allocation3]  }
  0x24   :  { %s2398_s22 = scalar_lea.hbm %s3025_s3, 2048 }
  0x25   :  { %p2399_p2 = scmp.ne.s32.totalorder %s3025_s3, %s2398_s22  ;;  %p2402_p3 = scmp.lt.u32.totalorder %s2398_s22, %s3025_s3 }
  0x27   :  { %p2404_p4 = pnand %p2402_p3, %p2399_p2 }
  0x29   :  { %2407 = shalt.err (!%p2404_p4)
}
  0x2a   :  { %s2408_s27 = scalar_lea.vmem %s43_s10, 2048  ;;  %p2413_p6 = scmp.lt.s32.totalorder %s43_s10, %s43_s10 }
  0x2b   :  { %p2409_p5 = scmp.ne.s32.totalorder %s43_s10, %s2408_s27  ;;  %p2414_p7 = scmp.lt.s32.totalorder %s2408_s27, %s2408_s27 }
  0x2d   :  { %p2415_p8 = por %p2414_p7, %p2413_p6 }
  0x2f   :  { %p2416_p9 = pnand %p2415_p8, %p2409_p5 }
  0x31   :  { %2419 = shalt.err (!%p2416_p9)
}
  0x32   :  { %48 = dma.hbm_to_vmem [thread:$0]  %s3025_s3, 2048, %s43_s10, [#allocation6], %s2449_s28, %s2449_s28, %s2450_s29  }
  0x33   :  { %2442 = dma.done.wait [#allocation3], 128  }
  0x34   :  { %2443 = vsyncadd [#allocation3], 4294967168 }
  0x35   :  { %2444 = dma.done.wait [#allocation6], 4096  }
  0x36   :  { %2445 = vsyncadd [#allocation6], 4294963200  ;;  %v2453_v0 = vmov 0.0|0.0   ;;  %vm2454_vm0 = vmmov 0   ;;  %v2455_v1 = vmov 0.0   ;;  %v61_v2 = vld [vmem:[#allocation5] sm:$0xff] }
  0x37   :  { %2033 = vmatprep.subr.bf16.mxu0 %v2453_v0  ;;  %1645 = vmatprep.mubr.msk.f32.mxu0 %vm2454_vm0, %v2455_v1  ;;  %v62_v3 = vld [vmem:[#allocation5 + $0x8] sm:$0xff]  ;;  %v63_v4 = vld [vmem:[#allocation5 + $0x10] sm:$0xff]  ;;  %v85_v5 = vand.u32 4294901760, %v61_v2  ;;  %v64_v7 = vld [vmem:[#allocation5 + $0x18] sm:$0xff]  ;;  %s2456_s6 = smov [#allocation8]  }
  0x38   :  { %2177 = vmatprep.subr.bf16.mxu1 %v2453_v0  ;;  %1855 = vmatprep.mubr.msk.f32.mxu1 %vm2454_vm0, %v2455_v1  ;;  %v88_v6 = vand.u32 4294901760, %v62_v3  ;;  %v91_v8 = vand.u32 4294901760, %v63_v4  ;;  %v94_v9 = vand.u32 4294901760, %v64_v7  ;;  %v65_v10 = vld [vmem:[#allocation5 + $0x20] sm:$0xff]  ;;  %v66_v11 = vld [vmem:[#allocation5 + $0x28] sm:$0xff]  ;;  %v67_v16 = vld [vmem:[#allocation5 + $0x30] sm:$0xff] }
  0x39   :  { %v97_v14 = vand.u32 4294901760, %v65_v10  ;;  %v100_v15 = vand.u32 4294901760, %v66_v11  ;;  %v68_v17 = vld [vmem:[#allocation5 + $0x38] sm:$0xff]  ;;  %v103_v19 = vand.u32 4294901760, %v67_v16  ;;  %v69_v21 = vld [vmem:[#allocation5 + $0x40] sm:$0xff]  ;;  %v70_v22 = vld [vmem:[#allocation5 + $0x48] sm:$0xff]  ;;  %v2545_v24 = vsub.f32 %v61_v2, %v85_v5 }
  0x3a   :  { %v2535_v12 = vpack.c.bf16 %v88_v6, %v85_v5  ;;  %v2538_v13 = vpack.c.bf16 %v94_v9, %v91_v8  ;;  %v106_v20 = vand.u32 4294901760, %v68_v17  ;;  %v60_v23 = vld [vmem:[#allocation2] sm:$0xff]  ;;  %v2547_v25 = vsub.f32 %v62_v3, %v88_v6  ;;  %v71_v29 = vld [vmem:[#allocation5 + $0x50] sm:$0xff]  ;;  %v73_v32 = vld [vmem:[#allocation5 + $0x60] sm:$0xff]  ;;  %s1397_s7 = sshll.u32 %s2456_s6, 4  ;;  %s1398_s7 = int_to_ptr.vmem [resolvable:$true] %s1397_s7 }
  0x3b   :  { %v2542_v18 = vpack.c.bf16 %v100_v15, %v97_v14  ;;  %v109_v27 = vand.u32 4294901760, %v69_v21  ;;  %v112_v28 = vand.u32 4294901760, %v70_v22  ;;  %v72_v30 = vld [vmem:[#allocation5 + $0x58] sm:$0xff]  ;;  %v2553_v31 = vand.u32 4294901760, %v60_v23  ;;  %v74_v35 = vld [vmem:[#allocation5 + $0x68] sm:$0xff]  ;;  %v75_v36 = vld [vmem:[#allocation5 + $0x70] sm:$0xff]  ;;  %p2425_p11 = scmp.lt.s32.totalorder %s1398_s7, %s1398_s7 }
  0x3c   :  { %2035 = vmatpush3.bf16.msra.mxu0 %v2535_v12  ;;  %v2550_v26 = vpack.c.bf16 %v106_v20, %v103_v19  ;;  %v2555_v33 = vsub.f32 %v63_v4, %v91_v8  ;;  %v115_v34 = vand.u32 4294901760, %v71_v29  ;;  %v76_v37 = vld [vmem:[#allocation5 + $0x78] sm:$0xff]  ;;  %v118_v39 = vand.u32 4294901760, %v72_v30  ;;  %s2420_s8 = scalar_lea.vmem %s1398_s7, 128 }
  0x3d   :  { %2036 = vmatprep.subr.bf16.mxu0 %v2453_v0  ;;  %v2558_v38 = vpack.c.bf16 %v112_v28, %v109_v27  ;;  %v178_v40 = vand.u32 4294901760, %v2545_v24  ;;  %v185_v41 = vand.u32 4294901760, %v2547_v25  ;;  %v2562_v42 = vsub.f32 %v64_v7, %v94_v9  ;;  %p2421_p10 = scmp.ne.s32.totalorder %s1398_s7, %s2420_s8  ;;  %p2426_p12 = scmp.lt.s32.totalorder %s2420_s8, %s2420_s8 }
  0x3e   :  { %v2564_v43 = vsub.f32 %v65_v10, %v97_v14  ;;  %v2566_v44 = vsub.f32 %v66_v11, %v100_v15  ;;  %v2570_v45 = vsub.f32 %v60_v23, %v2553_v31  ;;  %v121_v46 = vand.u32 4294901760, %v73_v32 }
  0x3f   :  { %v124_v47 = vand.u32 4294901760, %v74_v35  ;;  %v127_v48 = vand.u32 4294901760, %v75_v36  ;;  %v130_v49 = vand.u32 4294901760, %v76_v37  ;;  %v2572_v50 = vsub.f32 %v67_v16, %v103_v19  ;;  %p2427_p13 = por %p2426_p12, %p2425_p11 }
  0x40   :  { %2038 = vmatpush3.bf16.msra.mxu0 %v2538_v13  ;;  %v2574_v51 = vsub.f32 %v68_v17, %v106_v20  ;;  %v2576_v52 = vsub.f32 %v69_v21, %v109_v27  ;;  %v192_v53 = vand.u32 4294901760, %v2555_v33  ;;  %v2580_v54 = vsub.f32 %v70_v22, %v112_v28 }
  0x41   :  { %2039 = vmatprep.subr.bf16.mxu0 %v2453_v0  ;;  %v2582_v55 = vpack.c.bf16 %v118_v39, %v115_v34  ;;  %v179_v56 = vsub.f32 %v2545_v24, %v178_v40  ;;  %v186_v57 = vsub.f32 %v2547_v25, %v185_v41  ;;  %v2587_v58 = vsub.f32 %v71_v29, %v115_v34  ;;  %p2428_p0 = pnand %p2427_p13, %p2421_p10 }
  0x42   :  { %v2589_v59 = vsub.f32 %v72_v30, %v118_v39  ;;  %v2591_v60 = vsub.f32 %v73_v32, %v121_v46  ;;  %v167_v61 = vand.u32 4294901760, %v2570_v45  ;;  %v2594_v62 = vpack.c.bf16 %v124_v47, %v121_v46 }
  0x43   :  { %v2596_v63 = vsub.f32 %v74_v35, %v124_v47  ;;  %v2598_v2 = vpack.c.bf16 %v130_v49, %v127_v48  ;;  %v2600_v3 = vsub.f32 %v75_v36, %v127_v48  ;;  %v2602_v4 = vsub.f32 %v76_v37, %v130_v49 }
  0x44   :  { %2041 = vmatpush3.bf16.msra.mxu0 %v2542_v18  ;;  %v193_v5 = vsub.f32 %v2555_v33, %v192_v53  ;;  %v199_v6 = vand.u32 4294901760, %v2562_v42  ;;  %v206_v7 = vand.u32 4294901760, %v2564_v43  ;;  %v180_v8 = vand.u32 4294901760, %v179_v56 }
  0x45   :  { %2042 = vmatprep.subr.bf16.mxu0 %v2453_v0  ;;  %v187_v9 = vand.u32 4294901760, %v186_v57  ;;  %v213_v10 = vand.u32 4294901760, %v2566_v44  ;;  %v220_v11 = vand.u32 4294901760, %v2572_v50  ;;  %v168_v14 = vsub.f32 %v2570_v45, %v167_v61 }
  0x46   :  { %v227_v15 = vand.u32 4294901760, %v2574_v51  ;;  %v234_v16 = vand.u32 4294901760, %v2576_v52  ;;  %v241_v17 = vand.u32 4294901760, %v2580_v54  ;;  %v248_v19 = vand.u32 4294901760, %v2587_v58 }
  0x47   :  { %v255_v20 = vand.u32 4294901760, %v2589_v59  ;;  %v262_v21 = vand.u32 4294901760, %v2591_v60  ;;  %v269_v22 = vand.u32 4294901760, %v2596_v63  ;;  %v276_v23 = vand.u32 4294901760, %v2600_v3 }
  0x48   :  { %2044 = vmatpush3.bf16.msra.mxu0 %v2550_v26  ;;  %v283_v27 = vand.u32 4294901760, %v2602_v4  ;;  %v2623_v28 = vpack.c.bf16 %v185_v41, %v178_v40  ;;  %v2625_v29 = vpack.c.bf16 %v199_v6, %v192_v53  ;;  %v200_v30 = vsub.f32 %v2562_v42, %v199_v6 }
  0x49   :  { %2045 = vmatprep.subr.bf16.mxu0 %v2453_v0  ;;  %v2629_v32 = vpack.c.bf16 %v213_v10, %v206_v7  ;;  %v2631_v34 = vpack.c.bf16 %v227_v15, %v220_v11  ;;  %v2633_v35 = vpack.c.bf16 %v241_v17, %v234_v16  ;;  %v2636_v36 = vpack.c.bf16 %v255_v20, %v248_v19 }
  0x4a   :  { %v2638_v37 = vpack.c.bf16 %v269_v22, %v262_v21  ;;  %v2640_v39 = vpack.c.bf16 %v283_v27, %v276_v23  ;;  %v169_v40 = vand.u32 4294901760, %v168_v14  ;;  %v194_v41 = vand.u32 4294901760, %v193_v5 }
  0x4b   :  { %v2058_v46 = vpack.c.bf16 %v187_v9, %v180_v8  ;;  %v201_v47 = vand.u32 4294901760, %v200_v30  ;;  %v207_v48 = vsub.f32 %v2564_v43, %v206_v7  ;;  %v214_v49 = vsub.f32 %v2566_v44, %v213_v10 }
  0x4c   :  { %2047 = vmatpush3.bf16.msra.mxu0 %v2558_v38  ;;  %v221_v53 = vsub.f32 %v2572_v50, %v220_v11  ;;  %v228_v14 = vsub.f32 %v2574_v51, %v227_v15  ;;  %v235_v5 = vsub.f32 %v2576_v52, %v234_v16  ;;  %v242_v10 = vsub.f32 %v2580_v54, %v241_v17 }
  0x4d   :  { %2048 = vmatprep.subr.bf16.mxu0 %v2453_v0  ;;  %v2061_v56 = vpack.c.bf16 %v201_v47, %v194_v41  ;;  %v208_v57 = vand.u32 4294901760, %v207_v48  ;;  %v215_v6 = vand.u32 4294901760, %v214_v49  ;;  %v249_v15 = vsub.f32 %v2587_v58, %v248_v19 }
  0x4e   :  { %v222_v8 = vand.u32 4294901760, %v221_v53  ;;  %v229_v9 = vand.u32 4294901760, %v228_v14  ;;  %v236_v11 = vand.u32 4294901760, %v235_v5  ;;  %v256_v41 = vsub.f32 %v2589_v59, %v255_v20  ;;  %v728_v5 = vld [vmem:[#allocation7 + $0x10] sm:$0xff] }
  0x4f   :  { %v2064_v7 = vpack.c.bf16 %v215_v6, %v208_v57  ;;  %v263_v16 = vsub.f32 %v2591_v60, %v262_v21  ;;  %v250_v47 = vand.u32 4294901760, %v249_v15  ;;  %v270_v17 = vsub.f32 %v2596_v63, %v269_v22 }
  0x50   :  { %2050 = vmatpush3.bf16.msra.mxu0 %v2582_v55  ;;  %v2067_v30 = vpack.c.bf16 %v229_v9, %v222_v8  ;;  %v257_v48 = vand.u32 4294901760, %v256_v41  ;;  %v277_v19 = vsub.f32 %v2600_v3, %v276_v23  ;;  %v284_v20 = vsub.f32 %v2602_v4, %v283_v27  ;;  %v726_v23 = vld [vmem:[#allocation7] sm:$0xff]  ;;  %v727_v27 = vld [vmem:[#allocation7 + $0x8] sm:$0xff] }
  0x51   :  { %2051 = vmatprep.subr.bf16.mxu0 %v2453_v0  ;;  %v264_v49 = vand.u32 4294901760, %v263_v16  ;;  %v2082_v14 = vpack.c.bf16 %v2547_v25, %v2545_v24  ;;  %v750_v8 = vand.u32 4294901760, %v726_v23  ;;  %v753_v9 = vand.u32 4294901760, %v727_v27 }
  0x52   :  { %v2073_v53 = vpack.c.bf16 %v257_v48, %v250_v47  ;;  %v278_v57 = vand.u32 4294901760, %v277_v19  ;;  %v285_v6 = vand.u32 4294901760, %v284_v20  ;;  %v2091_v16 = vpack.c.bf16 %v2574_v51, %v2572_v50  ;;  %v740_v47 = vld [vmem:[#allocation7 + $0x70] sm:$0xff]  ;;  %v741_v48 = vld [vmem:[#allocation7 + $0x78] sm:$0xff] }
  0x53   :  { %v2674_v25 = vpack.c.bf16 %v753_v9, %v750_v8  ;;  %v2100_v50 = vpack.c.bf16 %v2596_v63, %v2591_v60  ;;  %v2103_v51 = vpack.c.bf16 %v2602_v4, %v2600_v3  ;;  %v735_v60 = vld [vmem:[#allocation7 + $0x48] sm:$0xff]  ;;  %v736_v63 = vld [vmem:[#allocation7 + $0x50] sm:$0xff] }
  0x54   :  { %2053 = vmatpush3.bf16.msra.mxu0 %v2594_v62  ;;  %v2079_v22 = vpack.c.bf16 %v285_v6, %v278_v57  ;;  %v780_v3 = vand.u32 4294901760, %v736_v63  ;;  %v792_v57 = vand.u32 4294901760, %v740_v47  ;;  %v795_v6 = vand.u32 4294901760, %v741_v48 }
  0x55   :  { %2054 = vmatprep.subr.bf16.mxu0 %v2453_v0  ;;  %2179 = vmatpush3.bf16.msra.mxu1 %v2674_v25 }
  0x56   :  { %2180 = vmatprep.subr.bf16.mxu1 %v2453_v0 }
  0x58   :  { %2056 = vmatpush3.bf16.msra.mxu0 %v2598_v2 }
  0x59   :  { %2057 = vmatprep.subr.bf16.mxu0 %v2453_v0 }
  0x5b   :  { %1646 = vmatmul.mubr.f32.vlgmr.msra.gmra.mrb[0].mxu0 %v169_v40  ;;  %v243_v40 = vand.u32 4294901760, %v242_v10  ;;  %v729_v10 = vld [vmem:[#allocation7 + $0x18] sm:$0xff] }
  0x5c   :  { %2059 = vmatpush3.bf16.msra.mxu0 %v2058_v46  ;;  %1680 = vmatprep.mubr.msk.f32.mxu0 %vm2454_vm0, %v2455_v1  ;;  %v759_v24 = vand.u32 4294901760, %v729_v10 }
  0x5d   :  { %2060 = vmatprep.subr.bf16.mxu0 %v2453_v0  ;;  %v2070_v46 = vpack.c.bf16 %v243_v40, %v236_v11  ;;  %v756_v11 = vand.u32 4294901760, %v728_v5  ;;  %v2678_v40 = vsub.f32 %v727_v27, %v753_v9  ;;  %v2811_v27 = vpack.c.bf16 %v795_v6, %v792_v57 }
  0x5e   :  { %v2682_v41 = vsub.f32 %v729_v10, %v759_v24 }
  0x5f   :  { %v2680_v15 = vsub.f32 %v728_v5, %v756_v11  ;;  %v2813_v5 = vsub.f32 %v741_v48, %v795_v6 }
  0x60   :  { %2062 = vmatpush3.bf16.msra.mxu0 %v2061_v56  ;;  %v271_v56 = vand.u32 4294901760, %v270_v17 }
  0x61   :  { %2063 = vmatprep.subr.bf16.mxu0 %v2453_v0 }
  0x62   :  { %v2076_v21 = vpack.c.bf16 %v271_v56, %v264_v49 }
  0x64   :  { %2065 = vmatpush3.bf16.msra.mxu0 %v2064_v7  ;;  %v2085_v7 = vpack.c.bf16 %v2562_v42, %v2555_v33  ;;  %v2088_v33 = vpack.c.bf16 %v2566_v44, %v2564_v43  ;;  %v2687_v42 = vpack.c.bf16 %v759_v24, %v756_v11  ;;  %v2094_v43 = vpack.c.bf16 %v2580_v54, %v2576_v52  ;;  %v733_v52 = vld [vmem:[#allocation7 + $0x38] sm:$0xff] }
  0x65   :  { %2066 = vmatprep.subr.bf16.mxu0 %v2453_v0  ;;  %v2097_v44 = vpack.c.bf16 %v2589_v59, %v2587_v58  ;;  %v734_v59 = vld [vmem:[#allocation7 + $0x40] sm:$0xff]  ;;  %v857_v11 = vand.u32 4294901760, %v2680_v15  ;;  %v864_v24 = vand.u32 4294901760, %v2682_v41 }
  0x66   :  { %2182 = vmatpush3.bf16.msra.mxu1 %v2687_v42 }
  0x67   :  { %2183 = vmatprep.subr.bf16.mxu1 %v2453_v0 }
  0x68   :  { %2068 = vmatpush3.bf16.msra.mxu0 %v2067_v30  ;;  %v2676_v30 = vsub.f32 %v726_v23, %v750_v8  ;;  %v2808_v23 = vsub.f32 %v740_v47, %v792_v57 }
  0x69   :  { %2069 = vmatprep.subr.bf16.mxu0 %v2453_v0 }
  0x6c   :  { %2071 = vmatpush3.bf16.msra.mxu0 %v2070_v46 }
  0x6d   :  { %2072 = vmatprep.subr.bf16.mxu0 %v2453_v0 }
  0x70   :  { %2074 = vmatpush3.bf16.msra.mxu0 %v2073_v53  ;;  %v2795_v53 = vsub.f32 %v736_v63, %v780_v3 }
  0x71   :  { %2075 = vmatprep.subr.bf16.mxu0 %v2453_v0 }
  0x72   :  { %v913_v47 = vand.u32 4294901760, %v2795_v53 }
  0x74   :  { %2077 = vmatpush3.bf16.msra.mxu0 %v2076_v21  ;;  %v914_v6 = vsub.f32 %v2795_v53, %v913_v47 }
  0x75   :  { %2078 = vmatprep.subr.bf16.mxu0 %v2453_v0 }
  0x78   :  { %2080 = vmatpush3.bf16.msra.mxu0 %v2079_v22  ;;  %v843_v22 = vand.u32 4294901760, %v2676_v30 }
  0x79   :  { %2081 = vmatprep.subr.bf16.mxu0 %v2453_v0 }
  0x7b   :  { %1681 = vmatmul.mubr.f32.vlgmr.msra.gmra.mrb[0].mxu0 %v2553_v31 }
  0x7c   :  { %2083 = vmatpush3.bf16.msra.mxu0 %v2082_v14  ;;  %1715 = vmatprep.mubr.msk.f32.mxu0 %vm2454_vm0, %v2455_v1  ;;  %v850_v14 = vand.u32 4294901760, %v2678_v40 }
  0x7d   :  { %2084 = vmatprep.subr.bf16.mxu0 %v2453_v0 }
  0x7e   :  { %v851_v8 = vsub.f32 %v2678_v40, %v850_v14 }
  0x80   :  { %2086 = vmatpush3.bf16.msra.mxu0 %v2085_v7  ;;  %v844_v7 = vsub.f32 %v2676_v30, %v843_v22  ;;  %v852_v10 = vand.u32 4294901760, %v851_v8  ;;  %v915_v8 = vand.u32 4294901760, %v914_v6 }
  0x81   :  { %2087 = vmatprep.subr.bf16.mxu0 %v2453_v0 }
  0x82   :  { %v845_v9 = vand.u32 4294901760, %v844_v7 }
  0x84   :  { %2089 = vmatpush3.bf16.msra.mxu0 %v2088_v33  ;;  %v2825_v33 = vpack.c.bf16 %v852_v10, %v845_v9 }
  0x85   :  { %2090 = vmatprep.subr.bf16.mxu0 %v2453_v0 }
  0x88   :  { %2092 = vmatpush3.bf16.msra.mxu0 %v2091_v16  ;;  %v858_v16 = vsub.f32 %v2680_v15, %v857_v11 }
  0x89   :  { %2093 = vmatprep.subr.bf16.mxu0 %v2453_v0 }
  0x8c   :  { %2095 = vmatpush3.bf16.msra.mxu0 %v2094_v43  ;;  %v865_v43 = vsub.f32 %v2682_v41, %v864_v24 }
  0x8d   :  { %2096 = vmatprep.subr.bf16.mxu0 %v2453_v0 }
  0x90   :  { %2098 = vmatpush3.bf16.msra.mxu0 %v2097_v44  ;;  %v859_v44 = vand.u32 4294901760, %v858_v16 }
  0x91   :  { %2099 = vmatprep.subr.bf16.mxu0 %v2453_v0 }
  0x94   :  { %2101 = vmatpush3.bf16.msra.mxu0 %v2100_v50  ;;  %v866_v50 = vand.u32 4294901760, %v865_v43 }
  0x95   :  { %2102 = vmatprep.subr.bf16.mxu0 %v2453_v0 }
  0x98   :  { %2104 = vmatpush3.bf16.msra.mxu0 %v2103_v51 }
  0x99   :  { %2105 = vmatprep.subr.bf16.mxu0 %v2453_v0 }
  0x9b   :  { %1716 = vmatmul.mubr.f32.vlgmr.msra.gmra.mrb[0].mxu0 %v2570_v45 }
  0x9c   :  { %2107 = vmatpush3.bf16.msra.mxu0 %v2535_v12  ;;  %1750 = vmatprep.mubr.msk.f32.mxu0 %vm2454_vm0, %v2455_v1 }
  0x9d   :  { %2108 = vmatprep.subr.bf16.mxu0 %v2453_v0 }
  0xa0   :  { %2110 = vmatpush3.bf16.msra.mxu0 %v2538_v13 }
  0xa1   :  { %2111 = vmatprep.subr.bf16.mxu0 %v2453_v0 }
  0xa4   :  { %2113 = vmatpush3.bf16.msra.mxu0 %v2542_v18 }
  0xa5   :  { %2114 = vmatprep.subr.bf16.mxu0 %v2453_v0 }
  0xa8   :  { %2116 = vmatpush3.bf16.msra.mxu0 %v2550_v26 }
  0xa9   :  { %2117 = vmatprep.subr.bf16.mxu0 %v2453_v0 }
  0xac   :  { %2119 = vmatpush3.bf16.msra.mxu0 %v2558_v38 }
  0xad   :  { %2120 = vmatprep.subr.bf16.mxu0 %v2453_v0 }
  0xb0   :  { %2122 = vmatpush3.bf16.msra.mxu0 %v2582_v55 }
  0xb1   :  { %2123 = vmatprep.subr.bf16.mxu0 %v2453_v0 }
  0xb4   :  { %2125 = vmatpush3.bf16.msra.mxu0 %v2594_v62 }
  0xb5   :  { %2126 = vmatprep.subr.bf16.mxu0 %v2453_v0 }
  0xb8   :  { %2128 = vmatpush3.bf16.msra.mxu0 %v2598_v2 }
  0xb9   :  { %2129 = vmatprep.subr.bf16.mxu0 %v2453_v0 }
  0xbb   :  { %1751 = vmatmul.mubr.f32.vlgmr.msra.gmra.mrb[0].mxu0 %v167_v61  ;;  %v777_v61 = vand.u32 4294901760, %v735_v60 }
  0xbc   :  { %2131 = vmatpush3.bf16.msra.mxu0 %v2623_v28  ;;  %1785 = vmatprep.mubr.msk.f32.mxu0 %vm2454_vm0, %v2455_v1 }
  0xbd   :  { %2132 = vmatprep.subr.bf16.mxu0 %v2453_v0  ;;  %v2793_v49 = vsub.f32 %v735_v60, %v777_v61 }
  0xc0   :  { %2134 = vmatpush3.bf16.msra.mxu0 %v2625_v29  ;;  %v738_v29 = vld [vmem:[#allocation7 + $0x60] sm:$0xff] }
  0xc1   :  { %2135 = vmatprep.subr.bf16.mxu0 %v2453_v0 }
  0xc4   :  { %2137 = vmatpush3.bf16.msra.mxu0 %v2629_v32  ;;  %v739_v32 = vld [vmem:[#allocation7 + $0x68] sm:$0xff] }
  0xc5   :  { %2138 = vmatprep.subr.bf16.mxu0 %v2453_v0 }
  0xc8   :  { %2140 = vmatpush3.bf16.msra.mxu0 %v2631_v34  ;;  %v786_v34 = vand.u32 4294901760, %v738_v29 }
  0xc9   :  { %2141 = vmatprep.subr.bf16.mxu0 %v2453_v0 }
  0xca   :  { %v2801_v20 = vsub.f32 %v738_v29, %v786_v34 }
  0xcc   :  { %2143 = vmatpush3.bf16.msra.mxu0 %v2633_v35  ;;  %v789_v35 = vand.u32 4294901760, %v739_v32  ;;  %v3031_v10 = vand.u32 4294901760, %v2801_v20 }
  0xcd   :  { %2144 = vmatprep.subr.bf16.mxu0 %v2453_v0 }
  0xce   :  { %v2799_v19 = vpack.c.bf16 %v789_v35, %v786_v34  ;;  %v2803_v21 = vsub.f32 %v739_v32, %v789_v35 }
  0xd0   :  { %2146 = vmatpush3.bf16.msra.mxu0 %v2636_v36  ;;  %v3030_v16 = vand.u32 4294901760, %v2803_v21 }
  0xd1   :  { %2147 = vmatprep.subr.bf16.mxu0 %v2453_v0 }
  0xd4   :  { %2149 = vmatpush3.bf16.msra.mxu0 %v2638_v37 }
  0xd5   :  { %2150 = vmatprep.subr.bf16.mxu0 %v2453_v0 }
  0xd8   :  { %2152 = vmatpush3.bf16.msra.mxu0 %v2640_v39 }
  0xd9   :  { %2153 = vmatprep.subr.bf16.mxu0 %v2453_v0 }
  0xdb   :  { %1786 = vmatmul.mubr.f32.vlgmr.msra.gmra.mrb[0].mxu0 %v2553_v31 }
  0xdc   :  { %2155 = vmatpush3.bf16.msra.mxu0 %v2535_v12  ;;  %1820 = vmatprep.mubr.msk.f32.mxu0 %vm2454_vm0, %v2455_v1  ;;  %v730_v12 = vld [vmem:[#allocation7 + $0x20] sm:$0xff] }
  0xdd   :  { %2156 = vmatprep.subr.bf16.mxu0 %v2453_v0 }
  0xe0   :  { %2158 = vmatpush3.bf16.msra.mxu0 %v2538_v13  ;;  %v731_v13 = vld [vmem:[#allocation7 + $0x28] sm:$0xff] }
  0xe1   :  { %2159 = vmatprep.subr.bf16.mxu0 %v2453_v0 }
  0xe4   :  { %2161 = vmatpush3.bf16.msra.mxu0 %v2542_v18  ;;  %v762_v18 = vand.u32 4294901760, %v730_v12 }
  0xe5   :  { %2162 = vmatprep.subr.bf16.mxu0 %v2453_v0 }
  0xe6   :  { %v2783_v36 = vsub.f32 %v730_v12, %v762_v18 }
  0xe8   :  { %2164 = vmatpush3.bf16.msra.mxu0 %v2550_v26  ;;  %v765_v26 = vand.u32 4294901760, %v731_v13  ;;  %v871_v51 = vand.u32 4294901760, %v2783_v36 }
  0xe9   :  { %2165 = vmatprep.subr.bf16.mxu0 %v2453_v0 }
  0xea   :  { %v2767_v45 = vpack.c.bf16 %v765_v26, %v762_v18  ;;  %v2785_v37 = vsub.f32 %v731_v13, %v765_v26  ;;  %v2835_v13 = vpack.c.bf16 %v866_v50, %v859_v44  ;;  %v872_v18 = vsub.f32 %v2783_v36, %v871_v51 }
  0xeb   :  { %v928_v44 = vsub.f32 %v2801_v20, %v3031_v10  ;;  %v935_v50 = vsub.f32 %v2803_v21, %v3030_v16 }
  0xec   :  { %2167 = vmatpush3.bf16.msra.mxu0 %v2558_v38  ;;  %v732_v38 = vld [vmem:[#allocation7 + $0x30] sm:$0xff]  ;;  %2185 = vmatpush3.bf16.msra.mxu1 %v2767_v45  ;;  %v878_v12 = vand.u32 4294901760, %v2785_v37  ;;  %v2232_v6 = vpack.c.bf16 %v2785_v37, %v2783_v36  ;;  %v3032_v36 = vand.u32 4294901760, %v2801_v20 }
  0xed   :  { %2168 = vmatprep.subr.bf16.mxu0 %v2453_v0  ;;  %v768_v54 = vand.u32 4294901760, %v732_v38  ;;  %2186 = vmatprep.subr.bf16.mxu1 %v2453_v0 }
  0xee   :  { %v879_v26 = vsub.f32 %v2785_v37, %v878_v12  ;;  %v3033_v37 = vand.u32 4294901760, %v2803_v21 }
  0xef   :  { %v2787_v39 = vsub.f32 %v732_v38, %v768_v54  ;;  %v873_v38 = vand.u32 4294901760, %v872_v18  ;;  %v929_v18 = vand.u32 4294901760, %v928_v44  ;;  %v2244_v44 = vpack.c.bf16 %v2803_v21, %v2801_v20 }
  0xf0   :  { %2170 = vmatpush3.bf16.msra.mxu0 %v2582_v55  ;;  %v771_v55 = vand.u32 4294901760, %v733_v52 }
  0xf1   :  { %2171 = vmatprep.subr.bf16.mxu0 %v2453_v0 }
  0xf2   :  { %v2771_v58 = vpack.c.bf16 %v771_v55, %v768_v54  ;;  %v2789_v46 = vsub.f32 %v733_v52, %v771_v55  ;;  %v880_v52 = vand.u32 4294901760, %v879_v26  ;;  %v885_v54 = vand.u32 4294901760, %v2787_v39 }
  0xf3   :  { %v936_v26 = vand.u32 4294901760, %v935_v50  ;;  %v2247_v50 = vpack.c.bf16 %v2813_v5, %v2808_v23 }
  0xf4   :  { %2173 = vmatpush3.bf16.msra.mxu0 %v2594_v62  ;;  %2188 = vmatpush3.bf16.msra.mxu1 %v2771_v58  ;;  %v892_v55 = vand.u32 4294901760, %v2789_v46  ;;  %v886_v60 = vsub.f32 %v2787_v39, %v885_v54 }
  0xf5   :  { %2174 = vmatprep.subr.bf16.mxu0 %v2453_v0  ;;  %2189 = vmatprep.subr.bf16.mxu1 %v2453_v0 }
  0xf8   :  { %2176 = vmatpush3.bf16.msra.mxu0 %v2598_v2  ;;  %v737_v2 = vld [vmem:[#allocation7 + $0x58] sm:$0xff] }
  0xf9   :  { %v783_v4 = vand.u32 4294901760, %v737_v2 }
  0xfb   :  { %1821 = vmatmul.mubr.f32.vlgmr.msra.gmra.mrb[0].mxu0 %v2553_v31  ;;  %v774_v31 = vand.u32 4294901760, %v734_v59  ;;  %v2779_v28 = vpack.c.bf16 %v783_v4, %v780_v3  ;;  %v2797_v56 = vsub.f32 %v737_v2, %v783_v4  ;;  %v906_v3 = vand.u32 4294901760, %v2793_v49 }
  0xfd   :  { %v2775_v62 = vpack.c.bf16 %v777_v61, %v774_v31  ;;  %v2791_v17 = vsub.f32 %v734_v59, %v774_v31  ;;  %v2208_v59 = vpack.c.bf16 %v880_v52, %v873_v38  ;;  %v893_v31 = vsub.f32 %v2789_v46, %v892_v55 }
  0xfe   :  { %v887_v61 = vand.u32 4294901760, %v886_v60  ;;  %v907_v32 = vsub.f32 %v2793_v49, %v906_v3  ;;  %v920_v48 = vand.u32 4294901760, %v2797_v56  ;;  %v3029_v38 = vand.u32 4294901760, %v2808_v23 }
  0xff   :  { %2191 = vmatpush3.bf16.msra.mxu1 %v2775_v62  ;;  %v894_v63 = vand.u32 4294901760, %v893_v31  ;;  %v899_v2 = vand.u32 4294901760, %v2791_v17  ;;  %v3028_v52 = vand.u32 4294901760, %v2813_v5  ;;  %v2220_v60 = vpack.c.bf16 %v936_v26, %v929_v18  ;;  %v1407_v18 = vld [vmem:[%s3024_s2] ss:$0 sm:$0xff] }
 0x100   :  { %2192 = vmatprep.subr.bf16.mxu1 %v2453_v0  ;;  %v908_v35 = vand.u32 4294901760, %v907_v32  ;;  %v921_v7 = vsub.f32 %v2797_v56, %v920_v48  ;;  %v942_v31 = vsub.f32 %v2808_v23, %v3029_v38 }
 0x101   :  { %v2211_v4 = vpack.c.bf16 %v894_v63, %v887_v61  ;;  %v900_v29 = vsub.f32 %v2791_v17, %v899_v2  ;;  %v949_v61 = vsub.f32 %v2813_v5, %v3028_v52 }
 0x102   :  { %v922_v9 = vand.u32 4294901760, %v921_v7  ;;  %v943_v63 = vand.u32 4294901760, %v942_v31  ;;  %v2235_v7 = vpack.c.bf16 %v2789_v46, %v2787_v39  ;;  %v2292_v39 = vpack.c.bf16 %v3033_v37, %v3032_v36 }
 0x103   :  { %2194 = vmatpush3.bf16.msra.mxu1 %v2779_v28  ;;  %v901_v34 = vand.u32 4294901760, %v900_v29  ;;  %v950_v29 = vand.u32 4294901760, %v949_v61  ;;  %v3034_v46 = vand.u32 4294901760, %v2808_v23 }
 0x104   :  { %2195 = vmatprep.subr.bf16.mxu1 %v2453_v0  ;;  %v2217_v43 = vpack.c.bf16 %v922_v9, %v915_v8  ;;  %v2238_v8 = vpack.c.bf16 %v2793_v49, %v2791_v17  ;;  %v2241_v9 = vpack.c.bf16 %v2797_v56, %v2795_v53  ;;  %v3035_v17 = vand.u32 4294901760, %v2813_v5 }
 0x105   :  { %v2214_v57 = vpack.c.bf16 %v908_v35, %v901_v34  ;;  %v2223_v32 = vpack.c.bf16 %v950_v29, %v943_v63  ;;  %v2226_v34 = vpack.c.bf16 %v2678_v40, %v2676_v30  ;;  %v2229_v35 = vpack.c.bf16 %v2682_v41, %v2680_v15 }
 0x106   :  { %v2280_v30 = vpack.c.bf16 %v878_v12, %v871_v51  ;;  %v2283_v40 = vpack.c.bf16 %v892_v55, %v885_v54  ;;  %v2286_v15 = vpack.c.bf16 %v906_v3, %v899_v2  ;;  %v2289_v41 = vpack.c.bf16 %v920_v48, %v913_v47 }
 0x107   :  { %2197 = vmatpush3.bf16.msra.mxu1 %v2799_v19  ;;  %v2295_v49 = vpack.c.bf16 %v3035_v17, %v3034_v46 }
 0x108   :  { %2198 = vmatprep.subr.bf16.mxu1 %v2453_v0 }
 0x10b   :  { %2200 = vmatpush3.bf16.msra.mxu1 %v2811_v27 }
 0x10c   :  { %2201 = vmatprep.subr.bf16.mxu1 %v2453_v0 }
 0x1ce   :  { %v721_v26 = vpop.f32.mrb[0].mxu0 }
 0x1cf   :  { %v2321_v31 = vadd.f32 %v1407_v18, %v721_v26  ;;  %v1822_v61 = vpop.f32.mrb[1].mxu0 }
 0x1d1   :  { %2352 = vtanh.f32 %v2321_v31 }
 0x1db   :  { %v2353_v63 = vpop.eup %2352 }
 0x1dc   :  { %v2902_v29 = vand.u32 4294901760, %v2353_v63 }
 0x1de   :  { %v831_v52 = vsub.f32 %v2353_v63, %v2902_v29 }
 0x1e0   :  { %v832_v38 = vand.u32 4294901760, %v831_v52 }
 0x1e2   :  { %v833_v16 = vsub.f32 %v831_v52, %v832_v38 }
 0x1e4   :  { %v834_v10 = vand.u32 4294901760, %v833_v16 }
 0x1e6   :  { %1856 = vmatmul.mubr.f32.vlgmr.msra.gmra.mrb[0].mxu1 %v834_v10 }
 0x1e7   :  { %2203 = vmatpush3.bf16.msra.mxu1 %v2825_v33  ;;  %1890 = vmatprep.mubr.msk.f32.mxu1 %vm2454_vm0, %v2455_v1  ;;  %v2274_v33 = vpack.c.bf16 %v850_v14, %v843_v22 }
 0x1e8   :  { %2204 = vmatprep.subr.bf16.mxu1 %v2453_v0 }
 0x1eb   :  { %2206 = vmatpush3.bf16.msra.mxu1 %v2835_v13  ;;  %v2277_v13 = vpack.c.bf16 %v864_v24, %v857_v11 }
 0x1ec   :  { %2207 = vmatprep.subr.bf16.mxu1 %v2453_v0 }
 0x1ef   :  { %2209 = vmatpush3.bf16.msra.mxu1 %v2208_v59 }
 0x1f0   :  { %2210 = vmatprep.subr.bf16.mxu1 %v2453_v0 }
 0x1f3   :  { %2212 = vmatpush3.bf16.msra.mxu1 %v2211_v4 }
 0x1f4   :  { %2213 = vmatprep.subr.bf16.mxu1 %v2453_v0 }
 0x1f7   :  { %2215 = vmatpush3.bf16.msra.mxu1 %v2214_v57 }
 0x1f8   :  { %2216 = vmatprep.subr.bf16.mxu1 %v2453_v0 }
 0x1fb   :  { %2218 = vmatpush3.bf16.msra.mxu1 %v2217_v43 }
 0x1fc   :  { %2219 = vmatprep.subr.bf16.mxu1 %v2453_v0 }
 0x1ff   :  { %2221 = vmatpush3.bf16.msra.mxu1 %v2220_v60 }
 0x200   :  { %2222 = vmatprep.subr.bf16.mxu1 %v2453_v0 }
 0x203   :  { %2224 = vmatpush3.bf16.msra.mxu1 %v2223_v32 }
 0x204   :  { %2225 = vmatprep.subr.bf16.mxu1 %v2453_v0 }
 0x206   :  { %1891 = vmatmul.mubr.f32.vlgmr.msra.gmra.mrb[0].mxu1 %v2902_v29 }
 0x207   :  { %2227 = vmatpush3.bf16.msra.mxu1 %v2226_v34  ;;  %1925 = vmatprep.mubr.msk.f32.mxu1 %vm2454_vm0, %v2455_v1 }
 0x208   :  { %2228 = vmatprep.subr.bf16.mxu1 %v2453_v0 }
 0x20b   :  { %2230 = vmatpush3.bf16.msra.mxu1 %v2229_v35 }
 0x20c   :  { %2231 = vmatprep.subr.bf16.mxu1 %v2453_v0 }
 0x20f   :  { %2233 = vmatpush3.bf16.msra.mxu1 %v2232_v6 }
 0x210   :  { %2234 = vmatprep.subr.bf16.mxu1 %v2453_v0 }
 0x213   :  { %2236 = vmatpush3.bf16.msra.mxu1 %v2235_v7 }
 0x214   :  { %2237 = vmatprep.subr.bf16.mxu1 %v2453_v0 }
 0x217   :  { %2239 = vmatpush3.bf16.msra.mxu1 %v2238_v8 }
 0x218   :  { %2240 = vmatprep.subr.bf16.mxu1 %v2453_v0 }
 0x21b   :  { %2242 = vmatpush3.bf16.msra.mxu1 %v2241_v9 }
 0x21c   :  { %2243 = vmatprep.subr.bf16.mxu1 %v2453_v0 }
 0x21f   :  { %2245 = vmatpush3.bf16.msra.mxu1 %v2244_v44 }
 0x220   :  { %2246 = vmatprep.subr.bf16.mxu1 %v2453_v0 }
 0x223   :  { %2248 = vmatpush3.bf16.msra.mxu1 %v2247_v50 }
 0x224   :  { %2249 = vmatprep.subr.bf16.mxu1 %v2453_v0 }
 0x226   :  { %1926 = vmatmul.mubr.f32.vlgmr.msra.gmra.mrb[0].mxu1 %v831_v52 }
 0x227   :  { %2251 = vmatpush3.bf16.msra.mxu1 %v2674_v25  ;;  %1960 = vmatprep.mubr.msk.f32.mxu1 %vm2454_vm0, %v2455_v1 }
 0x228   :  { %2252 = vmatprep.subr.bf16.mxu1 %v2453_v0 }
 0x22b   :  { %2254 = vmatpush3.bf16.msra.mxu1 %v2687_v42 }
 0x22c   :  { %2255 = vmatprep.subr.bf16.mxu1 %v2453_v0 }
 0x22f   :  { %2257 = vmatpush3.bf16.msra.mxu1 %v2767_v45 }
 0x230   :  { %2258 = vmatprep.subr.bf16.mxu1 %v2453_v0 }
 0x233   :  { %2260 = vmatpush3.bf16.msra.mxu1 %v2771_v58 }
 0x234   :  { %2261 = vmatprep.subr.bf16.mxu1 %v2453_v0 }
 0x237   :  { %2263 = vmatpush3.bf16.msra.mxu1 %v2775_v62 }
 0x238   :  { %2264 = vmatprep.subr.bf16.mxu1 %v2453_v0 }
 0x23b   :  { %2266 = vmatpush3.bf16.msra.mxu1 %v2779_v28 }
 0x23c   :  { %2267 = vmatprep.subr.bf16.mxu1 %v2453_v0 }
 0x23f   :  { %2269 = vmatpush3.bf16.msra.mxu1 %v2799_v19 }
 0x240   :  { %2270 = vmatprep.subr.bf16.mxu1 %v2453_v0 }
 0x243   :  { %2272 = vmatpush3.bf16.msra.mxu1 %v2811_v27 }
 0x244   :  { %2273 = vmatprep.subr.bf16.mxu1 %v2453_v0 }
 0x246   :  { %1961 = vmatmul.mubr.f32.vlgmr.msra.gmra.mrb[0].mxu1 %v832_v38 }
 0x247   :  { %2275 = vmatpush3.bf16.msra.mxu1 %v2274_v33  ;;  %1995 = vmatprep.mubr.msk.f32.mxu1 %vm2454_vm0, %v2455_v1 }
 0x248   :  { %2276 = vmatprep.subr.bf16.mxu1 %v2453_v0 }
 0x24b   :  { %2278 = vmatpush3.bf16.msra.mxu1 %v2277_v13 }
 0x24c   :  { %2279 = vmatprep.subr.bf16.mxu1 %v2453_v0 }
 0x24f   :  { %2281 = vmatpush3.bf16.msra.mxu1 %v2280_v30 }
 0x250   :  { %2282 = vmatprep.subr.bf16.mxu1 %v2453_v0 }
 0x253   :  { %2284 = vmatpush3.bf16.msra.mxu1 %v2283_v40 }
 0x254   :  { %2285 = vmatprep.subr.bf16.mxu1 %v2453_v0 }
 0x257   :  { %2287 = vmatpush3.bf16.msra.mxu1 %v2286_v15 }
 0x258   :  { %2288 = vmatprep.subr.bf16.mxu1 %v2453_v0 }
 0x25b   :  { %2290 = vmatpush3.bf16.msra.mxu1 %v2289_v41 }
 0x25c   :  { %2291 = vmatprep.subr.bf16.mxu1 %v2453_v0 }
 0x25f   :  { %2293 = vmatpush3.bf16.msra.mxu1 %v2292_v39 }
 0x260   :  { %2294 = vmatprep.subr.bf16.mxu1 %v2453_v0 }
 0x263   :  { %2296 = vmatpush3.bf16.msra.mxu1 %v2295_v49 }
 0x264   :  { %2297 = vmatprep.subr.bf16.mxu1 %v2453_v0 }
 0x266   :  { %1996 = vmatmul.mubr.f32.vlgmr.msra.gmra.mrb[0].mxu1 %v2902_v29 }
 0x267   :  { %2299 = vmatpush3.bf16.msra.mxu1 %v2674_v25  ;;  %2030 = vmatprep.mubr.msk.f32.mxu1 %vm2454_vm0, %v2455_v1  ;;  %v1408_v1 = vld [vmem:[%s3026_s4] ss:$0 sm:$0xff] }
 0x268   :  { %2300 = vmatprep.subr.bf16.mxu1 %v2453_v0 }
 0x26b   :  { %2302 = vmatpush3.bf16.msra.mxu1 %v2687_v42 }
 0x26c   :  { %2303 = vmatprep.subr.bf16.mxu1 %v2453_v0 }
 0x26f   :  { %2305 = vmatpush3.bf16.msra.mxu1 %v2767_v45 }
 0x270   :  { %2306 = vmatprep.subr.bf16.mxu1 %v2453_v0 }
 0x273   :  { %2308 = vmatpush3.bf16.msra.mxu1 %v2771_v58 }
 0x274   :  { %2309 = vmatprep.subr.bf16.mxu1 %v2453_v0 }
 0x277   :  { %2311 = vmatpush3.bf16.msra.mxu1 %v2775_v62 }
 0x278   :  { %2312 = vmatprep.subr.bf16.mxu1 %v2453_v0 }
 0x27b   :  { %2314 = vmatpush3.bf16.msra.mxu1 %v2779_v28 }
 0x27c   :  { %2315 = vmatprep.subr.bf16.mxu1 %v2453_v0 }
 0x27f   :  { %2317 = vmatpush3.bf16.msra.mxu1 %v2799_v19 }
 0x280   :  { %2318 = vmatprep.subr.bf16.mxu1 %v2453_v0 }
 0x283   :  { %2320 = vmatpush3.bf16.msra.mxu1 %v2811_v27 }
 0x286   :  { %2031 = vmatmul.mubr.f32.vlgmr.msra.gmra.mrb[0].mxu1 %v2902_v29 }
 0x359   :  { %v1386_v25 = vpop.f32.mrb[0].mxu1 }
 0x35a   :  { %v2322_v42 = vadd.f32 %v1408_v1, %v1386_v25  ;;  %v2032_v45 = vpop.f32.mrb[1].mxu1 }
 0x35c   :  { %1390 = vst [vmem:[#allocation8] sm:$0xff] %v2322_v42 }
 0x35d   :  { %2431 = shalt.err (!%p2428_p0)
}
 0x35e   :  { %s2432_s11 = scalar_lea.hbm %s3027_s5, 128 }
 0x35f   :  { %p2433_p1 = scmp.ne.s32.totalorder %s3027_s5, %s2432_s11  ;;  %p2436_p2 = scmp.lt.u32.totalorder %s2432_s11, %s3027_s5 }
 0x361   :  { %p2438_p3 = pnand %p2436_p2, %p2433_p1 }
 0x363   :  { %2441 = shalt.err (!%p2438_p3)
}
 0x364   :  { %1400 = dma.vmem_to_hbm [thread:$0]  %s1398_s7, 128, %s3027_s5, [#allocation4]  }
 0x365   :  { %2446 = dma.done.wait [#allocation4], 128  }
 0x366   :  { %2447 = vsyncadd [#allocation4], 4294967168 }
 0x367   :  { %1404 = vsyncpa [#allocation3], 1 }
 0x368   :  { %1405 = vsyncpa [#allocation6], 1 }
 0x369   :  { %1406 = vsyncpa [#allocation4], 1 }

</bundles_post_ra>
